<compile_context>
chip_gen: v5e
topology: v5e:2x2
jax: 0.10.0
libtpu: 0.0.40
codegen_flags: <defaults>
</compile_context>

<pallas_src>
import functools

import jax
import jax.numpy as jnp
from jax.experimental import pallas as pl
from jax.experimental.pallas import tpu as pltpu


_LANE = 128


def _layernorm_kernel(x_ref, g_ref, b_ref, o_ref, *, eps: float):
    # x_ref / o_ref: (C, tile_T)  (batch dim squeezed out by the BlockSpec).
    # g_ref / b_ref: (C, 1) float32 — broadcast across the lane (time) axis.
    x = x_ref[...].astype(jnp.float32)                          # (C, tT)
    mean = jnp.mean(x, axis=0, keepdims=True)                   # (1, tT)  sublane reduce -> XLU
    centered = x - mean
    var = jnp.mean(centered * centered, axis=0, keepdims=True)  # (1, tT)
    inv = jax.lax.rsqrt(var + eps)                              # (1, tT)  EUP
    # Fold the per-channel affine into the normalization scale: one fused
    # output expression, no separate `y = centered * inv` full-tile temporary.
    o_ref[...] = (centered * (inv * g_ref[...]) + b_ref[...]).astype(o_ref.dtype)


def _choose_tile_t(T: int, C: int, itemsize: int,
                   target_block_bytes: int, min_t_blocks: int = 1) -> int:
    """Lane tile: multiple of 128 (or full T), sized by the f32 compute footprint."""
    if T <= _LANE:
        return T  # full-array-dim exemption from the 128-lane rule
    compute_itemsize = max(int(itemsize), 4)  # intermediates are f32
    t = target_block_bytes // max(1, C * compute_itemsize)
    t = max(_LANE, (t // _LANE) * _LANE)
    if min_t_blocks > 1 and T > _LANE * min_t_blocks:
        # Cap so the T axis yields >= min_t_blocks blocks (keep both v7x TCs busy).
        cap = max(_LANE, ((T // min_t_blocks) // _LANE) * _LANE)
        t = min(t, cap)
    if t >= T:
        return T  # never use a block larger than the array dim (no padded lanes)
    return t


def layer_norm_pallas(x, gamma, beta, eps: float = 1e-5):
    """x: (B, C, T). LayerNorm over the channel dim; same shape, no HBM transposes."""
    B, C, T = x.shape
    itemsize = jnp.dtype(x.dtype).itemsize

    # ~4 MiB (f32-equivalent) blocks: large enough that the ~0.35 µs per-step
    # overhead is <10% even at v7x's ~3.2 TB/s HBM, small enough that
    # double-buffered in/out blocks + the f32 compute temporaries fit the
    # explicit scoped-VMEM limit below on every generation.
    target_block_bytes = 4 << 20

    min_t_blocks = 2 if B == 1 else 1
    tile_t = _choose_tile_t(T, C, itemsize, target_block_bytes, min_t_blocks)

    # Explicit scoped-VMEM limit: the 16 MiB (v5e) / 32 MiB defaults can be
    # exceeded by 4 MiB blocks + f32 intermediates.  Keep >=16 MiB headroom
    # under physical VMEM (64 MiB on v7x, 128 MiB on v5e/v6e).
    try:
        vmem_cap = pltpu.get_tpu_info().vmem_capacity_bytes
    except Exception:
        vmem_cap = 64 << 20  # conservative (v7x-sized) fallback
    vmem_limit = int(min(48 << 20, vmem_cap - (16 << 20)))

    # Pre-cast params once in the wrapper; (C, 1) broadcasts over lanes.
    g2 = gamma.reshape(C, 1).astype(jnp.float32)
    b2 = beta.reshape(C, 1).astype(jnp.float32)

    kernel = functools.partial(_layernorm_kernel, eps=eps)
    grid = (B, pl.cdiv(T, tile_t))

    cost = pl.CostEstimate(
        flops=6 * B * C * T,
        transcendentals=B * T,
        bytes_accessed=2 * B * C * T * itemsize + 2 * C * 4,
    )

    return pl.pallas_call(
        kernel,
        out_shape=jax.ShapeDtypeStruct((B, C, T), x.dtype),
        grid_spec=pltpu.PrefetchScalarGridSpec(
            num_scalar_prefetch=0,
            grid=grid,
            in_specs=[
                # Leading None squeezes the batch dim out of the kernel ref.
                pl.BlockSpec((None, C, tile_t), lambda bi, ti: (bi, 0, ti)),
                pl.BlockSpec((C, 1), lambda bi, ti: (0, 0)),
                pl.BlockSpec((C, 1), lambda bi, ti: (0, 0)),
            ],
            out_specs=pl.BlockSpec((None, C, tile_t), lambda bi, ti: (bi, 0, ti)),
        ),
        compiler_params=pltpu.CompilerParams(
            dimension_semantics=("parallel", "parallel"),
            vmem_limit_bytes=vmem_limit,
        ),
        cost_estimate=cost,
    )(x, g2, b2)


def layer_norm_ref(x, gamma, beta, eps: float = 1e-5):
    # Pure-JAX reference mirroring F.layer_norm(x.mT, (C,), gamma, beta, eps).mT
    xt = jnp.transpose(x, (0, 2, 1)).astype(jnp.float32)
    mean = jnp.mean(xt, axis=-1, keepdims=True)
    var = jnp.mean((xt - mean) ** 2, axis=-1, keepdims=True)
    y = (xt - mean) * jax.lax.rsqrt(var + eps) * gamma + beta
    return jnp.transpose(y, (0, 2, 1)).astype(x.dtype)


if __name__ == "__main__":
    key = jax.random.PRNGKey(0)
    B, C, T = 2, 32, 256  # (batch, channels, time) — channels-first like PyTorch

    x = jax.random.normal(key, (B, C, T), dtype=jnp.float32)
    # Deterministic parameter init matching nn.Parameter(torch.ones/zeros(C))
    gamma = jnp.ones((C,), dtype=jnp.float32)
    beta = jnp.zeros((C,), dtype=jnp.float32)

    out = jax.block_until_ready(layer_norm_pallas(x, gamma, beta))
    ref = layer_norm_ref(x, gamma, beta)
    assert out.shape == (B, C, T)
    assert jnp.allclose(out, ref, atol=1e-5, rtol=1e-5), "f32 mismatch vs reference"

    # bf16 input, ragged T (full-dim block path), B == 1 (tile-splitting path).
    xb = jax.random.normal(jax.random.PRNGKey(1), (1, C, 200), dtype=jnp.bfloat16)
    outb = jax.block_until_ready(layer_norm_pallas(xb, gamma, beta))
    refb = layer_norm_ref(xb, gamma, beta)
    assert outb.shape == xb.shape
    assert jnp.allclose(outb.astype(jnp.float32), refb.astype(jnp.float32),
                        atol=2e-2, rtol=2e-2), "bf16 mismatch vs reference"

    print("KERNEL_OK")
</pallas_src>

<mosaic_0001>
module attributes {stable_mosaic.version = 11 : i64} {
  func.func @_layernorm_kernel(%arg0: i32, %arg1: i32, %arg2: memref<1x32x256xf32, #tpu.memory_space<vmem>>, %arg3: memref<32x1xf32, #tpu.memory_space<vmem>>, %arg4: memref<32x1xf32, #tpu.memory_space<vmem>>, %arg5: memref<1x32x256xf32, #tpu.memory_space<vmem>>) attributes {dimension_semantics = [#tpu.dimension_semantics<parallel>, #tpu.dimension_semantics<parallel>], iteration_bounds = array<i64: 2, 1>, scalar_prefetch = 0 : i64, scratch_operands = 0 : i64, tpu.core_type = #tpu.core_type<tc>, window_params = [{transform_indices = @transform_0, window_bounds = array<i64: 1, 32, 256>}, {pipeline_mode = #tpu.pipeline_mode<synchronous>, transform_indices = @transform_1, window_bounds = array<i64: 32, 1>}, {pipeline_mode = #tpu.pipeline_mode<synchronous>, transform_indices = @transform_2, window_bounds = array<i64: 32, 1>}, {transform_indices = @transform_3, window_bounds = array<i64: 1, 32, 256>}]} {
    %c0 = arith.constant 0 : index
    %c0_0 = arith.constant 0 : index
    %c0_1 = arith.constant 0 : index
    %0 = vector.load %arg2[%c0, %c0_0, %c0_1] : memref<1x32x256xf32, #tpu.memory_space<vmem>>, vector<1x32x256xf32>
    %1 = vector.shape_cast %0 : vector<1x32x256xf32> to vector<32x256xf32>
    %cst = arith.constant dense<0.000000e+00> : vector<256xf32>
    %2 = vector.multi_reduction <add>, %1, %cst [0] : vector<32x256xf32> to vector<256xf32>
    %3 = vector.shape_cast %2 : vector<256xf32> to vector<1x256xf32>
    %cst_2 = arith.constant 3.200000e+01 : f32
    %4 = vector.broadcast %cst_2 : f32 to vector<1x256xf32>
    %5 = arith.divf %3, %4 : vector<1x256xf32>
    %6 = vector.broadcast %5 : vector<1x256xf32> to vector<32x256xf32>
    %7 = arith.subf %1, %6 : vector<32x256xf32>
    %8 = arith.mulf %7, %7 : vector<32x256xf32>
    %cst_3 = arith.constant dense<0.000000e+00> : vector<256xf32>
    %9 = vector.multi_reduction <add>, %8, %cst_3 [0] : vector<32x256xf32> to vector<256xf32>
    %10 = vector.shape_cast %9 : vector<256xf32> to vector<1x256xf32>
    %cst_4 = arith.constant 3.200000e+01 : f32
    %11 = vector.broadcast %cst_4 : f32 to vector<1x256xf32>
    %12 = arith.divf %10, %11 : vector<1x256xf32>
    %cst_5 = arith.constant 9.99999974E-6 : f32
    %13 = vector.broadcast %cst_5 : f32 to vector<1x256xf32>
    %14 = arith.addf %12, %13 : vector<1x256xf32>
    %15 = math.rsqrt %14 : vector<1x256xf32>
    %c0_6 = arith.constant 0 : index
    %c0_7 = arith.constant 0 : index
    %16 = vector.load %arg3[%c0_6, %c0_7] : memref<32x1xf32, #tpu.memory_space<vmem>>, vector<32x1xf32>
    %17 = vector.broadcast %15 : vector<1x256xf32> to vector<32x256xf32>
    %18 = vector.broadcast %16 : vector<32x1xf32> to vector<32x256xf32>
    %19 = arith.mulf %17, %18 : vector<32x256xf32>
    %20 = arith.mulf %7, %19 : vector<32x256xf32>
    %c0_8 = arith.constant 0 : index
    %c0_9 = arith.constant 0 : index
    %21 = vector.load %arg4[%c0_8, %c0_9] : memref<32x1xf32, #tpu.memory_space<vmem>>, vector<32x1xf32>
    %22 = vector.broadcast %21 : vector<32x1xf32> to vector<32x256xf32>
    %23 = arith.addf %20, %22 : vector<32x256xf32>
    %c0_10 = arith.constant 0 : index
    %c0_11 = arith.constant 0 : index
    %c0_12 = arith.constant 0 : index
    %24 = vector.load %arg5[%c0_10, %c0_11, %c0_12] : memref<1x32x256xf32, #tpu.memory_space<vmem>>, vector<1x32x256xf32>
    %25 = vector.shape_cast %24 : vector<1x32x256xf32> to vector<32x256xf32>
    %26 = vector.shape_cast %23 : vector<32x256xf32> to vector<1x32x256xf32>
    tpu.vector_store %arg5[%c0_10, %c0_11, %c0_12], %26 {strides = array<i32>} : memref<1x32x256xf32, #tpu.memory_space<vmem>>, vector<1x32x256xf32>,
    return
  }
  func.func @transform_0(%arg0: i32, %arg1: i32) -> (i32, i32, i32) {
    %c0_i32 = arith.constant 0 : i32
    %c0_i32_0 = arith.constant 0 : i32
    return %arg0, %c0_i32, %arg1 : i32, i32, i32
  }
  func.func @transform_1(%arg0: i32, %arg1: i32) -> (i32, i32) {
    %c0_i32 = arith.constant 0 : i32
    %c0_i32_0 = arith.constant 0 : i32
    %c0_i32_1 = arith.constant 0 : i32
    return %c0_i32, %c0_i32_0 : i32, i32
  }
  func.func @transform_2(%arg0: i32, %arg1: i32) -> (i32, i32) {
    %c0_i32 = arith.constant 0 : i32
    %c0_i32_0 = arith.constant 0 : i32
    %c0_i32_1 = arith.constant 0 : i32
    return %c0_i32, %c0_i32_0 : i32, i32
  }
  func.func @transform_3(%arg0: i32, %arg1: i32) -> (i32, i32, i32) {
    %c0_i32 = arith.constant 0 : i32
    %c0_i32_0 = arith.constant 0 : i32
    return %arg0, %c0_i32, %arg1 : i32, i32, i32
  }
}

</mosaic_0001>

<bundles_post_ra>
// kernel: tpu_custom_call.1
= control target key start
LH: loop header
LB: loop body
LE: loop exit
PB: predicated region body
PF: predicated region fallthrough
CT: control target
= control target key end

     0   :  { %8 = vsyncpa [#allocation3], 0  ;;  %s932_s0 = inlined_call_operand.hbm [shape: f32[2,32,256], index: 0, kind: input, shape index: {}]   ;;  %s933_s1 = inlined_call_operand.vmem [shape: f32[32,1], index: 1, kind: input, shape index: {}]   ;;  %s934_s2 = inlined_call_operand.vmem [shape: f32[32,1], index: 2, kind: input, shape index: {}]   ;;  %s935_s3 = inlined_call_operand.hbm [shape: f32[2,32,256], index: 3, kind: output, shape index: {}]  }
   0x1   :  { %10 = vsyncpa [#allocation3 + $0x1], 0 }
   0x2   :  { %11 = vsyncpa [#allocation4], 0 }
   0x3   :  { %13 = vsyncpa [#allocation4 + $0x1], 0  ;;  %s723_s12 = smov 0   ;;  %s725_s13 = smov 0  }
   0x4   :  { %s727_s14 = smov 0   ;;  %s729_s15 = smov 0  }
   0x5   :  { %s731_s16 = smov 0   ;;  %s733_s17 = smov 0  }
   0x6 LB: > { %s489_s18 = sadd.s32 4294967295, %s695_s17   ;;  %s490_s19 = sadd.s32 4294967294, %s695_s17   ;;  %s695_s17 = sphi %s733_s17, %s19_s17   ;;  %s691_s16 = sphi %s731_s16, %s944_s16   ;;  %s687_s15 = sphi %s729_s15, %s943_s15   ;;  %s683_s14 = sphi %s727_s14, %s942_s14   ;;  %s679_s13 = sphi %s725_s13, %s941_s13   ;;  %s675_s12 = sphi %s723_s12, %s940_s12  }
   0x7   : > { %s31_s20 = sadd.s32 1, %s691_s16  ;;  %s40_s21 = sadd.s32 1, %s683_s14 }
   0x8   : > { %p33_p0 = scmp.ge.s32.totalorder %s31_s20, 2  ;;  %p47_p1 = scmp.ne.s32.totalorder %s683_s14, %s679_s13 }
   0x9   : > { %p48_p2 = scmp.eq.s32.totalorder %s695_s17, 0  ;;  %p53_p3 = scmp.ne.s32.totalorder %s679_s13, %s675_s12 }
   0xa   : > { %s946_s20 = smov (%p33_p0, %s31_s20), 0  ;;  %p54_p5 = scmp.eq.s32.totalorder %s489_s18, 0 }
   0xb   : > { %p764_p4 = por %p48_p2, %p47_p1  ;;  %s35_s23 = ssub.s32 %s691_s16, %s946_s20 }
   0xc   : > { %p121_p6 = scmp.eq.s32.totalorder %s489_s18, 1  ;;  %p38_p7 = scmp.eq.s32.totalorder %s35_s23, 0 }
   0xd   : > { %p770_p8 = por %p54_p5, %p53_p3  ;;  %p127_p10 = scmp.eq.s32.totalorder %s490_s19, 1 }
   0xe   : > { %p774_p9 = por %p121_p6, %p47_p1  ;;  %p492_p12 = scmp.ge.s32.totalorder %s695_s17, 2 }
   0xf   : > { %s779_s26 = scalar_select %p38_p7, %s683_s14, %s40_s21  }
  0x10   : > { %p781_p11 = por %p127_p10, %p53_p3  ;;  %p518_p13 = scmp.lt.s32.totalorder %s695_s17, 2 }
  0x11   : > { %s153_s28 = sand.u32 1, %s683_s14   ;;  %s504_s30 = sshll.u32 %s691_s16, 6 }
  0x12   : > { %s493_s29 = sshll.u32 %s153_s28, 6  ;;  %s164_s6 = scalar_lea.hbm %s932_s0, %s504_s30 }
  0x13   : > { %s157_s7 = scalar_lea.vmem [#allocation2], %s493_s29  ;;  %s165_s9 = sshll.u32 %s164_s6, 4  ;;  %s166_s9 = int_to_ptr.hbm [resolvable:$true] %s165_s9 }
  0x14   : > { %s167_s8 = sshll.u32 %s157_s7, 4  ;;  %p511_p0 = pnand %p518_p13, %p764_p4  ;;  %s168_s8 = int_to_ptr.vmem [resolvable:$true] %s167_s8 }
  0x15   : > { %p496_p1 = scmp.ge.s32.totalorder %s695_s17, 1  ;;  %s154_s10 = scalar_lea.sflag [#allocation3], %s153_s28 }
  0x16   : > { %s697_s11 = smov 256   ;;  %s698_s18 = smov 16  }
  0x17   : > { %513 = dma.hbm_to_vmem [thread:$0]  (!%p511_p0), %s166_s9, 1024, %s168_s8, %s154_s10, %s697_s11, %s697_s11, %s698_s18  }
  0x18   : > { %p175_p2 = scmp.lt.s32.totalorder %s695_s17, 3 }
  0x1a   : > { %p176_p3 = pnand %p496_p1, %p175_p2 }
  0x1b   : > { %s797_s19 = sand.u32 (!%p176_p3), 1, %s679_s13  }
  0x1c   : > { %179 = sbr.rel (%p176_p3) target bundleno = 176 (0xb0), region = 32  ;;  %s497_s21 = sshll.u32 (!%p176_p3), %s797_s19, 6 }
  0x1d   : > { %s182_s23 = scalar_lea.sflag (!%p176_p3), [#allocation3], %s797_s19  ;;  %s803_s22 = scalar_lea.vmem (!%p176_p3), [#allocation2], %s497_s21 }
  0x21   : > { %666 = dma.done.wait (%p770_p8), %s182_s23, 1024  }
  0x22   : > { %668 = vsyncadd (%p770_p8), %s182_s23, 4294966272  ;;  %v699_v0 = vmov 0   ;;  %v306_v1 = vld [vmem:[%s933_s1 + $0x10] sm:$0xff]  ;;  %v304_v2 = vld [vmem:[%s933_s1] sm:$0xff]  ;;  %v700_v17 = vmov 32.0   ;;  %s505_s30 = sshll.u32 %s687_s15, 6 }
  0x23   : > { %575 = vset.pattern.permute.xlu1 %v699_v0  ;;  %574 = vset.pattern.permute.xlu0 %v699_v0  ;;  %v344_v3 = vld [vmem:[%s934_s2] sm:$0xff]  ;;  %v307_v4 = vld [vmem:[%s933_s1 + $0x18] sm:$0xff]  ;;  %v305_v5 = vld [vmem:[%s933_s1 + $0x8] sm:$0xff]  ;;  %577 = vrcp.f32 %v700_v17  ;;  %s398_s5 = scalar_lea.hbm %s935_s3, %s505_s30  ;;  %s385_s6 = scalar_lea.sflag [#allocation4], %s797_s19 }
  0x24   : > { %576 = vset.pattern.permute.xlu2 %v699_v0  ;;  %320 = vperm.xlu1 %575, %v306_v1   ;;  %v345_v6 = vld [vmem:[%s934_s2 + $0x8] sm:$0xff]  ;;  %v347_v7 = vld [vmem:[%s934_s2 + $0x18] sm:$0xff]  ;;  %v346_v8 = vld [vmem:[%s934_s2 + $0x10] sm:$0xff]  ;;  %s401_s24 = sshll.u32 %s398_s5, 4  ;;  %s633_s11 = scalar_lea.hbm %s935_s3, 128  ;;  %s402_s24 = int_to_ptr.hbm [resolvable:$true] %s401_s24 }
  0x25   : > { %310 = vperm.xlu0 %574, %v304_v2   ;;  %350 = vperm.xlu2 %576, %v344_v3   ;;  %v211_v9 = vld [vmem:[%s803_s22] sm:$0xff]  ;;  %v212_v10 = vld [vmem:[%s803_s22 + $0x8] sm:$0xff]  ;;  %v213_v11 = vld [vmem:[%s803_s22 + $0x10] sm:$0xff]  ;;  %s627_s7 = sshra.s32 %s402_s24, 4  ;;  %s628_s7 = int_to_ptr.hbm [resolvable:$true] %s627_s7 }
  0x26   : > { %v214_v12 = vld [vmem:[%s803_s22 + $0x18] sm:$0xff]  ;;  %v219_v13 = vadd.f32 %v213_v11, %v211_v9  ;;  %v215_v14 = vld [vmem:[%s803_s22 + $0x20] sm:$0xff]  ;;  %v216_v15 = vld [vmem:[%s803_s22 + $0x28] sm:$0xff]  ;;  %s629_s8 = scalar_lea.hbm %s628_s7, 64  ;;  %p634_p7 = scmp.lt.s32.totalorder %s628_s7, %s935_s3 }
  0x27   : > { %v228_v16 = vadd.f32 %v214_v12, %v212_v10  ;;  %v217_v19 = vld [vmem:[%s803_s22 + $0x30] sm:$0xff]  ;;  %v218_v20 = vld [vmem:[%s803_s22 + $0x38] sm:$0xff]  ;;  %s877_s22 = scalar_lea.vmem [#allocation5], %s497_s21  ;;  %p630_p4 = scmp.ne.s32.totalorder %s628_s7, %s629_s8 }
  0x28   : > { %v220_v18 = vadd.f32 %v219_v13, %v215_v14  ;;  %s399_s15 = sshll.u32 %s877_s22, 4  ;;  %p635_p8 = scmp.lt.s32.totalorder %s633_s11, %s629_s8  ;;  %s400_s15 = int_to_ptr.vmem [resolvable:$true] %s399_s15 }
  0x29   : > { %v229_v21 = vadd.f32 %v228_v16, %v216_v15  ;;  %v578_v26 = vpop.eup %577  ;;  %p631_p5 = pnand %p630_p4, %p774_p9 }
  0x2a   : > { %v221_v22 = vadd.f32 %v220_v18, %v217_v19  ;;  %v238_v28 = vmul.f32 32.0, %v578_v26  ;;  %vm242_vm0 = vweird.f32 %v578_v26  ;;  %p636_p10 = por %p635_p8, %p634_p7 }
  0x2b   : > { %v230_v23 = vadd.f32 %v229_v21, %v218_v20  ;;  %p632_p6 = pneg %p631_p5 }
  0x2c   : > { %325 = vperm.xlu1 %575, %v307_v4   ;;  %v222_v24 = vrot.slane %v221_v22, 4  ;;  %v239_v31 = vsub.f32 1.0, %v238_v28 }
  0x2d   : > { %315 = vperm.xlu0 %574, %v305_v5   ;;  %355 = vperm.xlu2 %576, %v345_v6   ;;  %v231_v25 = vrot.slane %v230_v23, 4  ;;  %p637_p13 = pnand %p636_p10, %p632_p6 }
  0x2e   : > { %v223_v27 = vadd.f32 %v222_v24, %v221_v22  ;;  %v240_v34 = vmul.f32 %v578_v26, %v239_v31 }
  0x2f   : > { %v232_v29 = vadd.f32 %v231_v25, %v230_v23 }
  0x30   : > { %v224_v30 = vrot.slane %v223_v27, 2  ;;  %v241_v37 = vadd.f32 %v578_v26, %v240_v34 }
  0x31   : > { %v233_v32 = vrot.slane %v232_v29, 2 }
  0x32   : > { %v225_v33 = vadd.f32 %v224_v30, %v223_v27  ;;  %v243_v40 = vsel %vm242_vm0, %v578_v26, %v241_v37 }
  0x33   : > { %v234_v35 = vadd.f32 %v233_v32, %v232_v29 }
  0x34   : > { %365 = vperm.xlu1 %575, %v347_v7   ;;  %v226_v36 = vrot.slane %v225_v33, 1 }
  0x35   : > { %360 = vperm.xlu0 %574, %v346_v8   ;;  %v235_v38 = vrot.slane %v234_v35, 1 }
  0x36   : > { %v227_v39 = vadd.f32 %v226_v36, %v225_v33 }
  0x37   : > { %v236_v41 = vadd.f32 %v235_v38, %v234_v35 }
  0x38   : > { %v244_v42 = vmul.f32 %v243_v40, %v227_v39 }
  0x39   : > { %v245_v43 = vmul.f32 %v243_v40, %v236_v41 }
  0x3a   : > { %v841_v44 = vsub.f32 %v211_v9, %v244_v42  ;;  %v843_v45 = vsub.f32 %v213_v11, %v244_v42  ;;  %v849_v48 = vsub.f32 %v215_v14, %v244_v42  ;;  %v861_v54 = vsub.f32 %v217_v19, %v244_v42 }
  0x3b   : > { %v845_v46 = vsub.f32 %v212_v10, %v245_v43  ;;  %v847_v47 = vsub.f32 %v214_v12, %v245_v43  ;;  %v851_v49 = vsub.f32 %v216_v15, %v245_v43  ;;  %v863_v55 = vsub.f32 %v218_v20, %v245_v43 }
  0x3c   : > { %v254_v50 = vmul.f32 %v841_v44, %v841_v44  ;;  %v256_v51 = vmul.f32 %v843_v45, %v843_v45  ;;  %v258_v56 = vmul.f32 %v849_v48, %v849_v48  ;;  %v260_v60 = vmul.f32 %v861_v54, %v861_v54 }
  0x3d   : > { %v255_v52 = vmul.f32 %v845_v46, %v845_v46  ;;  %v257_v53 = vmul.f32 %v847_v47, %v847_v47  ;;  %v259_v57 = vmul.f32 %v851_v49, %v851_v49  ;;  %v261_v61 = vmul.f32 %v863_v55, %v863_v55 }
  0x3e   : > { %v262_v58 = vadd.f32 %v256_v51, %v254_v50 }
  0x3f   : > { %v271_v59 = vadd.f32 %v257_v53, %v255_v52 }
  0x40   : > { %v263_v62 = vadd.f32 %v262_v58, %v258_v56 }
  0x41   : > { %v272_v63 = vadd.f32 %v271_v59, %v259_v57 }
  0x42   : > { %v264_v0 = vadd.f32 %v263_v62, %v260_v60 }
  0x43   : > { %v273_v1 = vadd.f32 %v272_v63, %v261_v61 }
  0x44   : > { %v265_v2 = vrot.slane %v264_v0, 4 }
  0x45   : > { %v274_v3 = vrot.slane %v273_v1, 4 }
  0x46   : > { %v266_v4 = vadd.f32 %v265_v2, %v264_v0 }
  0x47   : > { %v275_v5 = vadd.f32 %v274_v3, %v273_v1 }
  0x48   : > { %v267_v6 = vrot.slane %v266_v4, 2 }
  0x49   : > { %v276_v7 = vrot.slane %v275_v5, 2 }
  0x4a   : > { %v268_v8 = vadd.f32 %v267_v6, %v266_v4 }
  0x4b   : > { %v277_v9 = vadd.f32 %v276_v7, %v275_v5 }
  0x4c   : > { %v269_v10 = vrot.slane %v268_v8, 1 }
  0x4d   : > { %v278_v11 = vrot.slane %v277_v9, 1 }
  0x4e   : > { %v270_v12 = vadd.f32 %v269_v10, %v268_v8 }
  0x4f   : > { %v279_v13 = vadd.f32 %v278_v11, %v277_v9 }
  0x50   : > { %v280_v14 = vmul.f32 %v270_v12, %v243_v40 }
  0x51   : > { %v281_v15 = vmul.f32 %v279_v13, %v243_v40 }
  0x52   : > { %v282_v16 = vadd.f32 1e-05, %v280_v14 }
  0x53   : > { %v283_v17 = vadd.f32 1e-05, %v281_v15 }
  0x54   : > { %579 = vrsqrt.f32 %v282_v16  ;;  %vm290_vm1 = vweird.f32 %v282_v16 }
  0x55   : > { %581 = vrsqrt.f32 %v283_v17  ;;  %vm300_vm3 = vweird.f32 %v283_v17 }
  0x5a   : > { %v580_v18 = vpop.eup %579 }
  0x5b   : > { %v582_v19 = vpop.eup %581  ;;  %v285_v20 = vmul.f32 %v580_v18, %v282_v16  ;;  %vm291_vm2 = vweird.f32 %v580_v18 }
  0x5c   : > { %v295_v21 = vmul.f32 %v582_v19, %v283_v17  ;;  %vm301_vm4 = vweird.f32 %v582_v19  ;;  %vm292_vm5 = vmor %vm290_vm1, %vm291_vm2 }
  0x5d   : > { %v286_v22 = vmul.f32 %v580_v18, %v285_v20  ;;  %vm302_vm6 = vmor %vm300_vm3, %vm301_vm4 }
  0x5e   : > { %v296_v23 = vmul.f32 %v582_v19, %v295_v21 }
  0x5f   : > { %v287_v24 = vmul.f32 0.5, %v286_v22 }
  0x60   : > { %v297_v25 = vmul.f32 0.5, %v296_v23 }
  0x61   : > { %v288_v26 = vsub.f32 1.5, %v287_v24 }
  0x62   : > { %v298_v27 = vsub.f32 1.5, %v297_v25 }
  0x63   : > { %v289_v28 = vmul.f32 %v580_v18, %v288_v26 }
  0x64   : > { %v299_v29 = vmul.f32 %v582_v19, %v298_v27 }
  0x65   : > { %v293_v30 = vsel %vm292_vm5, %v580_v18, %v289_v28 }
  0x66   : > { %v303_v31 = vsel %vm302_vm6, %v582_v19, %v299_v29 }
  0x7f   : > { %v351_v36 = vpop.permute.xlu2 %350 }
  0x87   : > { %v356_v57 = vpop.permute.xlu2 %355 }
  0x96   : > { %v321_v32 = vpop.permute.xlu1 %320 }
  0x97   : > { %v311_v33 = vpop.permute.xlu0 %310  ;;  %v332_v51 = vmul.f32 %v321_v32, %v293_v30  ;;  %v333_v56 = vmul.f32 %v321_v32, %v303_v31 }
  0x98   : > { %v328_v34 = vmul.f32 %v311_v33, %v293_v30  ;;  %v329_v35 = vmul.f32 %v311_v33, %v303_v31 }
  0x99   : > { %v341_v63 = vmul.f32 %v333_v56, %v851_v49 }
  0x9a   : > { %v336_v37 = vmul.f32 %v328_v34, %v841_v44  ;;  %v337_v38 = vmul.f32 %v329_v35, %v845_v46 }
  0x9c   : > { %v368_v39 = vadd.f32 %v351_v36, %v336_v37  ;;  %v369_v40 = vadd.f32 %v351_v36, %v337_v38 }
  0x9e   : > { %376 = vst [vmem:[%s877_s22] sm:$0xff] %v368_v39  ;;  %v326_v41 = vpop.permute.xlu1 %325 }
  0x9f   : > { %377 = vst [vmem:[%s877_s22 + $0x8] sm:$0xff] %v369_v40  ;;  %v316_v42 = vpop.permute.xlu0 %315  ;;  %v334_v44 = vmul.f32 %v326_v41, %v293_v30  ;;  %v335_v52 = vmul.f32 %v326_v41, %v303_v31 }
  0xa0   : > { %v330_v43 = vmul.f32 %v316_v42, %v293_v30  ;;  %v331_v50 = vmul.f32 %v316_v42, %v303_v31 }
  0xa1   : > { %v342_v60 = vmul.f32 %v334_v44, %v861_v54  ;;  %v343_v61 = vmul.f32 %v335_v52, %v863_v55 }
  0xa2   : > { %v338_v46 = vmul.f32 %v330_v43, %v843_v45  ;;  %v339_v53 = vmul.f32 %v331_v50, %v847_v47  ;;  %v340_v45 = vmul.f32 %v332_v51, %v849_v48 }
  0xa4   : > { %v370_v58 = vadd.f32 %v356_v57, %v338_v46  ;;  %v371_v59 = vadd.f32 %v356_v57, %v339_v53 }
  0xa6   : > { %378 = vst [vmem:[%s877_s22 + $0x10] sm:$0xff] %v370_v58  ;;  %v366_v47 = vpop.permute.xlu1 %365 }
  0xa7   : > { %379 = vst [vmem:[%s877_s22 + $0x18] sm:$0xff] %v371_v59  ;;  %v361_v62 = vpop.permute.xlu0 %360  ;;  %v374_v0 = vadd.f32 %v366_v47, %v342_v60  ;;  %v375_v1 = vadd.f32 %v366_v47, %v343_v61 }
  0xa8   : > { %v372_v2 = vadd.f32 %v361_v62, %v340_v45  ;;  %v373_v54 = vadd.f32 %v361_v62, %v341_v63 }
  0xa9   : > { %382 = vst [vmem:[%s877_s22 + $0x30] sm:$0xff] %v374_v0 }
  0xaa   : > { %383 = vst [vmem:[%s877_s22 + $0x38] sm:$0xff] %v375_v1 }
  0xab   : > { %380 = vst [vmem:[%s877_s22 + $0x20] sm:$0xff] %v372_v2 }
  0xac   : > { %381 = vst [vmem:[%s877_s22 + $0x28] sm:$0xff] %v373_v54 }
  0xad   : > { %640 = shalt.err (!%p637_p13)
}
  0xae   : > { %s701_s19 = smov 256   ;;  %s702_s28 = smov 16  }
  0xaf   : > { %508 = dma.vmem_to_hbm [thread:$0]  (%p774_p9), %s400_s15, 1024, %s402_s24, %s385_s6, %s701_s19, %s701_s19, %s702_s28  }
  0xb0 PF: > { %s416_s29 = sand.u32 1, %s675_s12   ;;  %p515_p0 = pnand %p492_p12, %p781_p11 }
  0xb1   : > { %s417_s22 = scalar_lea.sflag [#allocation4], %s416_s29 }
  0xb2   : > { %p516_p1 = pneg %p515_p0 }
  0xb4   : > { %670 = dma.done.wait (%p516_p1), %s417_s22, 1024  }
  0xb5   : > { %672 = vsyncadd (%p516_p1), %s417_s22, 4294966272  ;;  %s19_s17 = sadd.s32 1, %s695_s17   ;;  %s940_s12 = smov %s679_s13 }
  0xb6   : > { %p16_p2 = scmp.ge.s32.totalorder %s19_s17, 4   ;;  %s941_s13 = smov %s683_s14 }
  0xb7   : > { %s942_s14 = smov %s779_s26  ;;  %s943_s15 = smov %s691_s16 }
  0xb8   : > { %s944_s16 = smov %s946_s20  ;;  %18 = sbr.rel (!%p16_p2) target bundleno = 6 (0x6), region = 77 }
  0xbd   :  { %423 = vsyncpa [#allocation3], 1 }
  0xbe   :  { %425 = vsyncpa [#allocation3 + $0x1], 1 }
  0xbf   :  { %426 = vsyncpa [#allocation4], 1 }
  0xc0   :  { %428 = vsyncpa [#allocation4 + $0x1], 1 }

</bundles_post_ra>
